<compile_context>
chip_gen: v7x
topology: tpu7x:2x2x1
jax: 0.10.0
libtpu: 0.0.40
codegen_flags: <defaults>
</compile_context>

<pallas_src>
import jax
import jax.numpy as jnp
from jax import lax
from jax.experimental import pallas as pl
from jax.experimental.pallas import tpu as pltpu


def _round_up(x, m):
    return (x + m - 1) // m * m


def _images_per_step(n, h, row_target=256):
    """Largest divisor of n whose row count nb*h stays within row_target."""
    nb = 1
    for cand in range(1, n + 1):
        if n % cand == 0 and cand * h <= row_target:
            nb = cand
    return nb


def _inception_kernel(x_ref, w_ref, b_ref, o_ref):
    # x_ref: (NB, Hp, Lpad)     padded activation, (wp, cin) packed into lanes
    # w_ref: (K*Lpad, W*Cout)   banded (Toeplitz-along-W) averaged weights
    # b_ref: (1, W*Cout)        f32 bias row (mean of branch biases)
    # o_ref: (NB, H, W*Cout)    lane-dense output block
    nb, _, lpad = x_ref.shape
    h_out = o_ref.shape[1]
    k_taps = w_ref.shape[0] // lpad

    # im2col LHS (NB*H, K*Lpad) built directly from Ref slices (plain loads, no
    # big materialized image in vregs); every piece is 128-lane aligned so the
    # concatenates are pure vreg placement.
    rows = []
    for b in range(nb):
        rows.append(jnp.concatenate(
            [x_ref[b, pl.ds(dy, h_out), :] for dy in range(k_taps)], axis=1))
    lhs = rows[0] if nb == 1 else jnp.concatenate(rows, axis=0)

    # One fused MXU contraction over all (dy, wp, cin) taps; f32 accumulation.
    acc = jnp.dot(lhs, w_ref[...], preferred_element_type=jnp.float32)
    acc = acc + b_ref[...]                                   # f32 epilogue
    o_ref[...] = acc.reshape(nb, h_out, -1).astype(o_ref.dtype)


def _prepare_weights(w_stack, b_stack, W, lane_pad, compute_dtype):
    """Center-align + average the branch kernels (f32), band along W, cast last."""
    num_k, K, _, Cin, Cout = w_stack.shape
    P = (K - 1) // 2
    Wp = W + 2 * P

    # 1) center-embed each (2i+1)^2 kernel in the KxK slot and average (f32).
    w_eff = jnp.zeros((K, K, Cin, Cout), jnp.float32)
    for i in range(num_k):
        k = 2 * i + 1
        off = P - i
        w_eff = w_eff.at[off:off + k, off:off + k].add(
            w_stack[i, :k, :k].astype(jnp.float32))
    w_eff = w_eff / float(num_k)
    b_eff = jnp.mean(b_stack.astype(jnp.float32), axis=0)

    # 2) band (block-Toeplitz) along W with one masked gather (no W-long
    #    scatter loop): wt[dy, wp, cin, x, cout] = w_eff[dy, wp - x, cin, cout].
    dxs = jnp.arange(Wp)[:, None] - jnp.arange(W)[None, :]          # (Wp, W)
    valid = ((dxs >= 0) & (dxs < K)).astype(jnp.float32)
    dxs_c = jnp.clip(dxs, 0, K - 1)
    wt = w_eff[:, dxs_c, :, :] * valid[None, :, :, None, None]      # (K,Wp,W,Cin,Cout)
    wt = jnp.transpose(wt, (0, 1, 3, 2, 4))                         # (K,Wp,Cin,W,Cout)
    wt = wt.reshape(K, Wp * Cin, W * Cout)

    # 3) pad the per-tap contraction lanes to lane_pad, flatten taps, cast last.
    wt = jnp.pad(wt, ((0, 0), (0, lane_pad - Wp * Cin), (0, 0)))
    wt = wt.reshape(K * lane_pad, W * Cout).astype(compute_dtype)

    # 4) bias row matching the (x, cout) output lane order; kept in f32.
    b_row = jnp.tile(b_eff, W).reshape(1, W * Cout)
    return wt, b_row


def inception_block_v1(x_nchw, w_stack, b_stack, *, compute_dtype=jnp.bfloat16,
                       images_per_step=None):
    """Forward pass identical to the PyTorch module (NCHW in, NCHW out)."""
    N, Cin, H, W = x_nchw.shape
    num_k, K, _, _, Cout = w_stack.shape
    P = (K - 1) // 2
    Hp, Wp = H + 2 * P, W + 2 * P
    WCout = W * Cout
    lane_pad = _round_up(Wp * Cin, 128)

    NB = images_per_step if images_per_step is not None else _images_per_step(N, H)
    assert N % NB == 0

    # Activation: NCHW -> NHWC -> spatial "same" pad -> pack (wp, cin) into
    # lanes -> pad lanes to a 128 multiple -> compute dtype (bf16) for the MXU.
    # TODO(synk): at realistic sizes do the pad/pack inside the kernel (DMA the
    # unpadded rows into a zeroed VMEM scratch) to avoid this extra HBM pass.
    x_nhwc = jnp.transpose(x_nchw, (0, 2, 3, 1))
    x_pad = jnp.pad(x_nhwc, ((0, 0), (P, P), (P, P), (0, 0)))
    x_packed = x_pad.reshape(N, Hp, Wp * Cin)
    x_packed = jnp.pad(x_packed, ((0, 0), (0, 0), (0, lane_pad - Wp * Cin)))
    x_packed = x_packed.astype(compute_dtype)

    wt, b_row = _prepare_weights(w_stack, b_stack, W, lane_pad, compute_dtype)

    out_flat = pl.pallas_call(
        _inception_kernel,
        out_shape=jax.ShapeDtypeStruct((N, H, WCout), x_nchw.dtype),
        grid_spec=pltpu.PrefetchScalarGridSpec(
            num_scalar_prefetch=0,
            grid=(N // NB,),
            in_specs=[
                pl.BlockSpec((NB, Hp, lane_pad), lambda n: (n, 0, 0)),
                # Constant blocks -> single-buffered (no point double-buffering
                # the largest resident operand).
                pl.BlockSpec((K * lane_pad, WCout), lambda n: (0, 0),
                             pipeline_mode=pl.Buffered(1)),
                pl.BlockSpec((1, WCout), lambda n: (0, 0),
                             pipeline_mode=pl.Buffered(1)),
            ],
            out_specs=pl.BlockSpec((NB, H, WCout), lambda n: (n, 0, 0)),
        ),
        compiler_params=pltpu.CompilerParams(
            dimension_semantics=("parallel",)),
    )(x_packed, wt, b_row)

    # (N, H, W*Cout) -> (N, H, W, Cout) is a free reshape; one small transpose
    # back to NCHW to match the PyTorch module's output layout.
    # TODO(synk): skip this transpose when the consumer accepts channel-last.
    out_nhwc = out_flat.reshape(N, H, W, Cout)
    return jnp.transpose(out_nhwc, (0, 3, 1, 2))


def init_params(key, in_channels, out_channels, num_kernels):
    """Kaiming-normal (fan_out, relu) weights, zero biases — matches __init__."""
    K = 2 * (num_kernels - 1) + 1
    w_stack = jnp.zeros((num_kernels, K, K, in_channels, out_channels),
                        jnp.float32)
    b_stack = jnp.zeros((num_kernels, out_channels), jnp.float32)
    keys = jax.random.split(key, num_kernels)
    for i in range(num_kernels):
        k = 2 * i + 1
        fan_out = out_channels * k * k
        std = (2.0 / fan_out) ** 0.5
        w = std * jax.random.normal(keys[i], (k, k, in_channels, out_channels),
                                    jnp.float32)
        w_stack = w_stack.at[i, :k, :k].set(w)
    return w_stack, b_stack


def reference(x_nchw, w_stack, b_stack):
    """Pure-JAX reference replicating the PyTorch forward (stack + mean)."""
    num_k = w_stack.shape[0]
    x_nhwc = jnp.transpose(x_nchw, (0, 2, 3, 1))
    outs = []
    for i in range(num_k):
        k = 2 * i + 1
        w = w_stack[i, :k, :k]
        y = lax.conv_general_dilated(
            x_nhwc, w, window_strides=(1, 1), padding=[(i, i), (i, i)],
            dimension_numbers=('NHWC', 'HWIO', 'NHWC'))
        outs.append(y + b_stack[i][None, None, None, :])
    res = jnp.mean(jnp.stack(outs, axis=-1), axis=-1)
    return jnp.transpose(res, (0, 3, 1, 2))


if __name__ == "__main__":
    N, C_IN, C_OUT, H, W = 2, 4, 16, 16, 16
    C_OUT = 8
    NUM_KERNELS = 6

    key = jax.random.PRNGKey(0)
    kx, kw = jax.random.split(key)
    x = jax.random.normal(kx, (N, C_IN, H, W), jnp.float32)
    w_stack, b_stack = init_params(kw, C_IN, C_OUT, NUM_KERNELS)

    ref = jax.block_until_ready(reference(x, w_stack, b_stack))

    # Exactness check of the banding/indexing with an f32 MXU path.
    fwd_f32 = jax.jit(
        lambda a, ws, bs: inception_block_v1(a, ws, bs,
                                             compute_dtype=jnp.float32))
    out_f32 = jax.block_until_ready(fwd_f32(x, w_stack, b_stack))
    assert out_f32.shape == (N, C_OUT, H, W), out_f32.shape
    assert jnp.allclose(out_f32, ref, atol=1e-4, rtol=1e-4), float(
        jnp.max(jnp.abs(out_f32 - ref)))

    # Performance path: bf16 operands, f32 accumulation (looser tolerance).
    fwd_bf16 = jax.jit(lambda a, ws, bs: inception_block_v1(a, ws, bs))
    out_bf16 = jax.block_until_ready(fwd_bf16(x, w_stack, b_stack))
    assert out_bf16.shape == (N, C_OUT, H, W), out_bf16.shape
    assert jnp.allclose(out_bf16, ref, atol=5e-2, rtol=5e-2), float(
        jnp.max(jnp.abs(out_bf16 - ref)))

    print("KERNEL_OK")
</pallas_src>

<mosaic_0001>
module attributes {stable_mosaic.version = 11 : i64} {
  func.func @_inception_kernel(%arg0: i32, %arg1: memref<2x26x128xf32, #tpu.memory_space<vmem>>, %arg2: memref<1408x128xf32, #tpu.memory_space<vmem>>, %arg3: memref<1x128xf32, #tpu.memory_space<vmem>>, %arg4: memref<2x16x128xf32, #tpu.memory_space<vmem>>) attributes {dimension_semantics = [#tpu.dimension_semantics<parallel>], iteration_bounds = array<i64: 1>, scalar_prefetch = 0 : i64, scratch_operands = 0 : i64, tpu.core_type = #tpu.core_type<tc>, window_params = [{transform_indices = @transform_0, window_bounds = array<i64: 2, 26, 128>}, {pipeline_mode = #tpu.pipeline_mode<synchronous>, transform_indices = @transform_1, window_bounds = array<i64: 1408, 128>}, {pipeline_mode = #tpu.pipeline_mode<synchronous>, transform_indices = @transform_2, window_bounds = array<i64: 1, 128>}, {transform_indices = @transform_3, window_bounds = array<i64: 2, 16, 128>}]} {
    %c0 = arith.constant 0 : index
    %c0_0 = arith.constant 0 : index
    %c0_1 = arith.constant 0 : index
    %0 = vector.load %arg1[%c0, %c0_0, %c0_1] : memref<2x26x128xf32, #tpu.memory_space<vmem>>, vector<1x16x128xf32>
    %1 = vector.shape_cast %0 : vector<1x16x128xf32> to vector<16x128xf32>
    %c0_2 = arith.constant 0 : index
    %c1 = arith.constant 1 : index
    %c0_3 = arith.constant 0 : index
    %2 = vector.load %arg1[%c0_2, %c1, %c0_3] : memref<2x26x128xf32, #tpu.memory_space<vmem>>, vector<1x16x128xf32>
    %3 = vector.shape_cast %2 : vector<1x16x128xf32> to vector<16x128xf32>
    %c0_4 = arith.constant 0 : index
    %c2 = arith.constant 2 : index
    %c0_5 = arith.constant 0 : index
    %4 = vector.load %arg1[%c0_4, %c2, %c0_5] : memref<2x26x128xf32, #tpu.memory_space<vmem>>, vector<1x16x128xf32>
    %5 = vector.shape_cast %4 : vector<1x16x128xf32> to vector<16x128xf32>
    %c0_6 = arith.constant 0 : index
    %c3 = arith.constant 3 : index
    %c0_7 = arith.constant 0 : index
    %6 = vector.load %arg1[%c0_6, %c3, %c0_7] : memref<2x26x128xf32, #tpu.memory_space<vmem>>, vector<1x16x128xf32>
    %7 = vector.shape_cast %6 : vector<1x16x128xf32> to vector<16x128xf32>
    %c0_8 = arith.constant 0 : index
    %c4 = arith.constant 4 : index
    %c0_9 = arith.constant 0 : index
    %8 = vector.load %arg1[%c0_8, %c4, %c0_9] : memref<2x26x128xf32, #tpu.memory_space<vmem>>, vector<1x16x128xf32>
    %9 = vector.shape_cast %8 : vector<1x16x128xf32> to vector<16x128xf32>
    %c0_10 = arith.constant 0 : index
    %c5 = arith.constant 5 : index
    %c0_11 = arith.constant 0 : index
    %10 = vector.load %arg1[%c0_10, %c5, %c0_11] : memref<2x26x128xf32, #tpu.memory_space<vmem>>, vector<1x16x128xf32>
    %11 = vector.shape_cast %10 : vector<1x16x128xf32> to vector<16x128xf32>
    %c0_12 = arith.constant 0 : index
    %c6 = arith.constant 6 : index
    %c0_13 = arith.constant 0 : index
    %12 = vector.load %arg1[%c0_12, %c6, %c0_13] : memref<2x26x128xf32, #tpu.memory_space<vmem>>, vector<1x16x128xf32>
    %13 = vector.shape_cast %12 : vector<1x16x128xf32> to vector<16x128xf32>
    %c0_14 = arith.constant 0 : index
    %c7 = arith.constant 7 : index
    %c0_15 = arith.constant 0 : index
    %14 = vector.load %arg1[%c0_14, %c7, %c0_15] : memref<2x26x128xf32, #tpu.memory_space<vmem>>, vector<1x16x128xf32>
    %15 = vector.shape_cast %14 : vector<1x16x128xf32> to vector<16x128xf32>
    %c0_16 = arith.constant 0 : index
    %c8 = arith.constant 8 : index
    %c0_17 = arith.constant 0 : index
    %16 = vector.load %arg1[%c0_16, %c8, %c0_17] : memref<2x26x128xf32, #tpu.memory_space<vmem>>, vector<1x16x128xf32>
    %17 = vector.shape_cast %16 : vector<1x16x128xf32> to vector<16x128xf32>
    %c0_18 = arith.constant 0 : index
    %c9 = arith.constant 9 : index
    %c0_19 = arith.constant 0 : index
    %18 = vector.load %arg1[%c0_18, %c9, %c0_19] : memref<2x26x128xf32, #tpu.memory_space<vmem>>, vector<1x16x128xf32>
    %19 = vector.shape_cast %18 : vector<1x16x128xf32> to vector<16x128xf32>
    %c0_20 = arith.constant 0 : index
    %c10 = arith.constant 10 : index
    %c0_21 = arith.constant 0 : index
    %20 = vector.load %arg1[%c0_20, %c10, %c0_21] : memref<2x26x128xf32, #tpu.memory_space<vmem>>, vector<1x16x128xf32>
    %21 = vector.shape_cast %20 : vector<1x16x128xf32> to vector<16x128xf32>
    %22 = tpu.concatenate %1, %3, %5, %7, %9, %11, %13, %15, %17, %19, %21 in 1 : vector<16x128xf32>, vector<16x128xf32>, vector<16x128xf32>, vector<16x128xf32>, vector<16x128xf32>, vector<16x128xf32>, vector<16x128xf32>, vector<16x128xf32>, vector<16x128xf32>, vector<16x128xf32>, vector<16x128xf32> -> vector<16x1408xf32>
    %c1_22 = arith.constant 1 : index
    %c0_23 = arith.constant 0 : index
    %c0_24 = arith.constant 0 : index
    %23 = vector.load %arg1[%c1_22, %c0_23, %c0_24] : memref<2x26x128xf32, #tpu.memory_space<vmem>>, vector<1x16x128xf32>
    %24 = vector.shape_cast %23 : vector<1x16x128xf32> to vector<16x128xf32>
    %c1_25 = arith.constant 1 : index
    %c1_26 = arith.constant 1 : index
    %c0_27 = arith.constant 0 : index
    %25 = vector.load %arg1[%c1_25, %c1_26, %c0_27] : memref<2x26x128xf32, #tpu.memory_space<vmem>>, vector<1x16x128xf32>
    %26 = vector.shape_cast %25 : vector<1x16x128xf32> to vector<16x128xf32>
    %c1_28 = arith.constant 1 : index
    %c2_29 = arith.constant 2 : index
    %c0_30 = arith.constant 0 : index
    %27 = vector.load %arg1[%c1_28, %c2_29, %c0_30] : memref<2x26x128xf32, #tpu.memory_space<vmem>>, vector<1x16x128xf32>
    %28 = vector.shape_cast %27 : vector<1x16x128xf32> to vector<16x128xf32>
    %c1_31 = arith.constant 1 : index
    %c3_32 = arith.constant 3 : index
    %c0_33 = arith.constant 0 : index
    %29 = vector.load %arg1[%c1_31, %c3_32, %c0_33] : memref<2x26x128xf32, #tpu.memory_space<vmem>>, vector<1x16x128xf32>
    %30 = vector.shape_cast %29 : vector<1x16x128xf32> to vector<16x128xf32>
    %c1_34 = arith.constant 1 : index
    %c4_35 = arith.constant 4 : index
    %c0_36 = arith.constant 0 : index
    %31 = vector.load %arg1[%c1_34, %c4_35, %c0_36] : memref<2x26x128xf32, #tpu.memory_space<vmem>>, vector<1x16x128xf32>
    %32 = vector.shape_cast %31 : vector<1x16x128xf32> to vector<16x128xf32>
    %c1_37 = arith.constant 1 : index
    %c5_38 = arith.constant 5 : index
    %c0_39 = arith.constant 0 : index
    %33 = vector.load %arg1[%c1_37, %c5_38, %c0_39] : memref<2x26x128xf32, #tpu.memory_space<vmem>>, vector<1x16x128xf32>
    %34 = vector.shape_cast %33 : vector<1x16x128xf32> to vector<16x128xf32>
    %c1_40 = arith.constant 1 : index
    %c6_41 = arith.constant 6 : index
    %c0_42 = arith.constant 0 : index
    %35 = vector.load %arg1[%c1_40, %c6_41, %c0_42] : memref<2x26x128xf32, #tpu.memory_space<vmem>>, vector<1x16x128xf32>
    %36 = vector.shape_cast %35 : vector<1x16x128xf32> to vector<16x128xf32>
    %c1_43 = arith.constant 1 : index
    %c7_44 = arith.constant 7 : index
    %c0_45 = arith.constant 0 : index
    %37 = vector.load %arg1[%c1_43, %c7_44, %c0_45] : memref<2x26x128xf32, #tpu.memory_space<vmem>>, vector<1x16x128xf32>
    %38 = vector.shape_cast %37 : vector<1x16x128xf32> to vector<16x128xf32>
    %c1_46 = arith.constant 1 : index
    %c8_47 = arith.constant 8 : index
    %c0_48 = arith.constant 0 : index
    %39 = vector.load %arg1[%c1_46, %c8_47, %c0_48] : memref<2x26x128xf32, #tpu.memory_space<vmem>>, vector<1x16x128xf32>
    %40 = vector.shape_cast %39 : vector<1x16x128xf32> to vector<16x128xf32>
    %c1_49 = arith.constant 1 : index
    %c9_50 = arith.constant 9 : index
    %c0_51 = arith.constant 0 : index
    %41 = vector.load %arg1[%c1_49, %c9_50, %c0_51] : memref<2x26x128xf32, #tpu.memory_space<vmem>>, vector<1x16x128xf32>
    %42 = vector.shape_cast %41 : vector<1x16x128xf32> to vector<16x128xf32>
    %c1_52 = arith.constant 1 : index
    %c10_53 = arith.constant 10 : index
    %c0_54 = arith.constant 0 : index
    %43 = vector.load %arg1[%c1_52, %c10_53, %c0_54] : memref<2x26x128xf32, #tpu.memory_space<vmem>>, vector<1x16x128xf32>
    %44 = vector.shape_cast %43 : vector<1x16x128xf32> to vector<16x128xf32>
    %45 = tpu.concatenate %24, %26, %28, %30, %32, %34, %36, %38, %40, %42, %44 in 1 : vector<16x128xf32>, vector<16x128xf32>, vector<16x128xf32>, vector<16x128xf32>, vector<16x128xf32>, vector<16x128xf32>, vector<16x128xf32>, vector<16x128xf32>, vector<16x128xf32>, vector<16x128xf32>, vector<16x128xf32> -> vector<16x1408xf32>
    %46 = tpu.concatenate %22, %45 in 0 : vector<16x1408xf32>, vector<16x1408xf32> -> vector<32x1408xf32>
    %c0_55 = arith.constant 0 : index
    %c0_56 = arith.constant 0 : index
    %47 = vector.load %arg2[%c0_55, %c0_56] : memref<1408x128xf32, #tpu.memory_space<vmem>>, vector<1408x128xf32>
    %cst = arith.constant dense<0.000000e+00> : vector<32x128xf32>
    %48 = tpu.matmul %46, %47, %cst {dimension_numbers = #tpu.dot_dimension_numbers<[1], [0], [0], [1], [0, 0, 1, 1], [], []>} : vector<32x1408xf32>, vector<1408x128xf32>, vector<32x128xf32> -> vector<32x128xf32>
    %c0_57 = arith.constant 0 : index
    %c0_58 = arith.constant 0 : index
    %49 = vector.load %arg3[%c0_57, %c0_58] : memref<1x128xf32, #tpu.memory_space<vmem>>, vector<1x128xf32>
    %50 = vector.broadcast %49 : vector<1x128xf32> to vector<32x128xf32>
    %51 = arith.addf %48, %50 : vector<32x128xf32>
    %52 = vector.shape_cast %51 : vector<32x128xf32> to vector<2x16x128xf32>
    %c0_59 = arith.constant 0 : index
    %c0_60 = arith.constant 0 : index
    %c0_61 = arith.constant 0 : index
    %53 = vector.load %arg4[%c0_59, %c0_60, %c0_61] : memref<2x16x128xf32, #tpu.memory_space<vmem>>, vector<2x16x128xf32>
    tpu.vector_store %arg4[%c0_59, %c0_60, %c0_61], %52 {strides = array<i32>} : memref<2x16x128xf32, #tpu.memory_space<vmem>>, vector<2x16x128xf32>,
    return
  }
  func.func @transform_0(%arg0: i32) -> (i32, i32, i32) {
    %c0_i32 = arith.constant 0 : i32
    %c0_i32_0 = arith.constant 0 : i32
    %c0_i32_1 = arith.constant 0 : i32
    return %arg0, %c0_i32, %c0_i32_0 : i32, i32, i32
  }
  func.func @transform_1(%arg0: i32) -> (i32, i32) {
    %c0_i32 = arith.constant 0 : i32
    %c0_i32_0 = arith.constant 0 : i32
    %c0_i32_1 = arith.constant 0 : i32
    return %c0_i32, %c0_i32_0 : i32, i32
  }
  func.func @transform_2(%arg0: i32) -> (i32, i32) {
    %c0_i32 = arith.constant 0 : i32
    %c0_i32_0 = arith.constant 0 : i32
    %c0_i32_1 = arith.constant 0 : i32
    return %c0_i32, %c0_i32_0 : i32, i32
  }
  func.func @transform_3(%arg0: i32) -> (i32, i32, i32) {
    %c0_i32 = arith.constant 0 : i32
    %c0_i32_0 = arith.constant 0 : i32
    %c0_i32_1 = arith.constant 0 : i32
    return %arg0, %c0_i32, %c0_i32_0 : i32, i32, i32
  }
}

</mosaic_0001>

<bundles_post_ra>
// kernel: tile.8
= control target key start
LH: loop header
LB: loop body
LE: loop exit
PB: predicated region body
PF: predicated region fallthrough
CT: control target
= control target key end

     0   :  { %s28_s0 = inlined_call_operand.vmem [shape: f32[8], index: 0, kind: input, shape index: {}]   ;;  %s29_s1 = inlined_call_operand.vmem [shape: f32[16,8], index: 1, kind: output, shape index: {}]  }
   0x1   :  { %v4_v0 = vld [vmem:[%s28_s0] ss:$0 sm:$0xff] }
   0x2   :  { %5 = vst [vmem:[%s29_s1] sm:$0xff] %v4_v0  ;;  %8 = vst [vmem:[%s29_s1 + $0x8] sm:$0xff] %v4_v0 }

// kernel: tile.9
= control target key start
LH: loop header
LB: loop body
LE: loop exit
PB: predicated region body
PF: predicated region fallthrough
CT: control target
= control target key end

     0   :  { %s131_s10 = smov 120   ;;  %s132_s11 = smov 104   ;;  %vm3_vm0 = vcmask 64512   ;;  %vm9_vm1 = vcmask 1048512   ;;  %vm15_vm2 = vcmask 982912   ;;  %vm21_vm3 = vcmask 917312   ;;  %s207_s0 = inlined_call_operand.vmem [shape: f32[16,8], index: 0, kind: input, shape index: {}]   ;;  %s208_s1 = inlined_call_operand.vmem [shape: f32[1,128], index: 1, kind: output, shape index: {}]  }
   0x1   :  { %v101_v0 = vld [vmem:[%s207_s0 + $0xf] sm:$0x1]   ;;  %v103_v1 = vld [vmem:[%s207_s0 + $0xd] sm:$0x1]   ;;  %v102_v2 = vld [vmem:[%s207_s0 + $0xe] sm:$0x1]  }
   0x2   :  { %7 = vrot.lane.b32.xlu0 %v101_v0, %s131_s10  ;;  %19 = vrot.lane.b32.xlu1 %v103_v1, %s132_s11  ;;  %v104_v3 = vld [vmem:[%s207_s0 + $0xc] sm:$0x1]   ;;  %s133_s16 = smov 112   ;;  %s134_s17 = smov 96   ;;  %v105_v4 = vld [vmem:[%s207_s0 + $0xb] sm:$0x1]  }
   0x3   :  { %v106_v5 = vld [vmem:[%s207_s0 + $0xa] sm:$0x1]   ;;  %v2_v6 = vld [vmem:[%s207_s0] sm:$0x1]   ;;  %s135_s24 = smov 88   ;;  %s136_s25 = smov 80  }
   0x4   :  { %4 = vst.msk [vmem:[#allocation0] sm:$0x1] %vm3_vm0, %v2_v6   ;;  %v107_v7 = vld [vmem:[%s207_s0 + $0x9] sm:$0x1]   ;;  %v108_v8 = vld [vmem:[%s207_s0 + $0x8] sm:$0x1]  }
   0x5   :  { %s137_s30 = smov 72   ;;  %s138_s2 = smov 64   ;;  %v109_v9 = vld [vmem:[%s207_s0 + $0x7] sm:$0x1]   ;;  %v110_v10 = vld [vmem:[%s207_s0 + $0x6] sm:$0x1]  }
   0x6   :  { %13 = vrot.lane.b32.xlu0 %v102_v2, %s133_s16  ;;  %25 = vrot.lane.b32.xlu1 %v104_v3, %s134_s17  ;;  %s139_s7 = smov 56   ;;  %s140_s8 = smov 48   ;;  %v111_v11 = vld [vmem:[%s207_s0 + $0x5] sm:$0x1]   ;;  %v112_v12 = vld [vmem:[%s207_s0 + $0x4] sm:$0x1]  }
   0x7   :  { %s141_s13 = smov 40   ;;  %s142_s14 = smov 32   ;;  %v113_v13 = vld [vmem:[%s207_s0 + $0x3] sm:$0x1]   ;;  %v114_v14 = vld [vmem:[%s207_s0 + $0x2] sm:$0x1]  }
   0x8   :  { %s143_s19 = smov 24   ;;  %s144_s20 = smov 16   ;;  %v115_v15 = vld [vmem:[%s207_s0 + $0x1] sm:$0x1]   ;;  %vm27_vm4 = vcmask 851712   ;;  %vm33_vm5 = vcmask 786112  }
   0x9   :  { %s145_s0 = smov 8   ;;  %vm39_vm6 = vcmask 720512   ;;  %vm45_vm7 = vcmask 654912   ;;  %vm51_vm8 = vcmask 589312   ;;  %vm57_vm9 = vcmask 523712  }
   0xa   :  { %31 = vrot.lane.b32.xlu0 %v105_v4, %s135_s24  ;;  %37 = vrot.lane.b32.xlu1 %v106_v5, %s136_s25  ;;  %vm63_vm10 = vcmask 458112   ;;  %vm69_vm11 = vcmask 392512   ;;  %vm75_vm12 = vcmask 326912   ;;  %vm81_vm13 = vcmask 261312  }
   0xb   :  { %vm87_vm14 = vcmask 195712   ;;  %vm93_vm15 = vcmask 130112  }
   0xe   :  { %43 = vrot.lane.b32.xlu0 %v107_v7, %s137_s30  ;;  %49 = vrot.lane.b32.xlu1 %v108_v8, %s138_s2 }
  0x12   :  { %55 = vrot.lane.b32.xlu0 %v109_v9, %s139_s7  ;;  %61 = vrot.lane.b32.xlu1 %v110_v10, %s140_s8 }
  0x16   :  { %67 = vrot.lane.b32.xlu0 %v111_v11, %s141_s13  ;;  %73 = vrot.lane.b32.xlu1 %v112_v12, %s142_s14 }
  0x1a   :  { %79 = vrot.lane.b32.xlu0 %v113_v13, %s143_s19  ;;  %85 = vrot.lane.b32.xlu1 %v114_v14, %s144_s20 }
  0x1e   :  { %91 = vrot.lane.b32.xlu0 %v115_v15, %s145_s0 }
  0x74   :  { %v8_v16 = vpop.permute.xlu0 %7   ;;  %v20_v17 = vpop.permute.xlu1 %19  }
  0x75   :  { %10 = vst.msk [vmem:[#allocation0] sm:$0x1] %vm9_vm1, %v8_v16  }
  0x78   :  { %v14_v18 = vpop.permute.xlu0 %13   ;;  %v26_v19 = vpop.permute.xlu1 %25  }
  0x79   :  { %16 = vst.msk [vmem:[#allocation0] sm:$0x1] %vm15_vm2, %v14_v18  }
  0x7a   :  { %22 = vst.msk [vmem:[#allocation0] sm:$0x1] %vm21_vm3, %v20_v17  }
  0x7b   :  { %28 = vst.msk [vmem:[#allocation0] sm:$0x1] %vm27_vm4, %v26_v19  }
  0x7c   :  { %v32_v20 = vpop.permute.xlu0 %31   ;;  %v38_v21 = vpop.permute.xlu1 %37  }
  0x7d   :  { %34 = vst.msk [vmem:[#allocation0] sm:$0x1] %vm33_vm5, %v32_v20  }
  0x7e   :  { %40 = vst.msk [vmem:[#allocation0] sm:$0x1] %vm39_vm6, %v38_v21  }
  0x80   :  { %v44_v22 = vpop.permute.xlu0 %43   ;;  %v50_v23 = vpop.permute.xlu1 %49  }
  0x81   :  { %46 = vst.msk [vmem:[#allocation0] sm:$0x1] %vm45_vm7, %v44_v22  }
  0x82   :  { %52 = vst.msk [vmem:[#allocation0] sm:$0x1] %vm51_vm8, %v50_v23  }
  0x84   :  { %v56_v24 = vpop.permute.xlu0 %55   ;;  %v62_v25 = vpop.permute.xlu1 %61  }
  0x85   :  { %58 = vst.msk [vmem:[#allocation0] sm:$0x1] %vm57_vm9, %v56_v24  }
  0x86   :  { %64 = vst.msk [vmem:[#allocation0] sm:$0x1] %vm63_vm10, %v62_v25  }
  0x88   :  { %v68_v26 = vpop.permute.xlu0 %67   ;;  %v74_v27 = vpop.permute.xlu1 %73  }
  0x89   :  { %70 = vst.msk [vmem:[#allocation0] sm:$0x1] %vm69_vm11, %v68_v26  }
  0x8a   :  { %76 = vst.msk [vmem:[#allocation0] sm:$0x1] %vm75_vm12, %v74_v27  }
  0x8c   :  { %v80_v28 = vpop.permute.xlu0 %79   ;;  %v86_v29 = vpop.permute.xlu1 %85  }
  0x8d   :  { %82 = vst.msk [vmem:[#allocation0] sm:$0x1] %vm81_vm13, %v80_v28  }
  0x8e   :  { %88 = vst.msk [vmem:[#allocation0] sm:$0x1] %vm87_vm14, %v86_v29  }
  0x90   :  { %v92_v30 = vpop.permute.xlu0 %91  }
  0x91   :  { %94 = vst.msk [vmem:[#allocation0] sm:$0x1] %vm93_vm15, %v92_v30  }
  0x98   :  { %v98_v31 = vld [vmem:[#allocation0] sm:$0x1] }
  0x99   :  { %100 = vst [vmem:[%s208_s1] sm:$0x1] %v98_v31 }

// kernel: _lambda_.1
= control target key start
LH: loop header
LB: loop body
LE: loop exit
PB: predicated region body
PF: predicated region fallthrough
CT: control target
= control target key end

     0   :  { %s1945_s1 = inlined_call_operand.vmem [shape: f32[1408,128], index: 1, kind: input, shape index: {}]   ;;  %s1946_s0 = inlined_call_operand.vmem [shape: f32[2,26,128], index: 0, kind: input, shape index: {}]   ;;  %s1947_s2 = inlined_call_operand.vmem [shape: f32[1,128], index: 2, kind: input, shape index: {}]   ;;  %s1948_s3 = inlined_call_operand.vmem [shape: f32[2,16,128], index: 3, kind: output, shape index: {}]  }
   0x1   :  { %v69_v0 = vld [vmem:[%s1945_s1 + $0x80] sm:$0xff]  ;;  %v70_v1 = vld [vmem:[%s1945_s1 + $0x88] sm:$0xff]  ;;  %v71_v11 = vld [vmem:[%s1945_s1 + $0x90] sm:$0xff] }
   0x2   :  { %v53_v2 = vld [vmem:[%s1945_s1] sm:$0xff]  ;;  %v1052_v3 = vpack.c.bf16 %v70_v1, %v69_v0  ;;  %v54_v4 = vld [vmem:[%s1945_s1 + $0x8] sm:$0xff]  ;;  %v72_v13 = vld [vmem:[%s1945_s1 + $0x98] sm:$0xff] }
   0x3   :  { %v101_v5 = vld [vmem:[%s1945_s1 + $0x180] sm:$0xff]  ;;  %v102_v6 = vld [vmem:[%s1945_s1 + $0x188] sm:$0xff]  ;;  %v1054_v7 = vpack.c.bf16 %v54_v4, %v53_v2  ;;  %v55_v14 = vld [vmem:[%s1945_s1 + $0x10] sm:$0xff]  ;;  %v1056_v16 = vpack.c.bf16 %v72_v13, %v71_v11 }
   0x4   :  { %v1084_v8 = vpack.c.bf16 %v102_v6, %v101_v5  ;;  %v85_v9 = vld [vmem:[%s1945_s1 + $0x100] sm:$0xff]  ;;  %v86_v10 = vld [vmem:[%s1945_s1 + $0x108] sm:$0xff]  ;;  %1053 = vmatprep.subr.bf16.mxu0 %v1052_v3  ;;  %v56_v15 = vld [vmem:[%s1945_s1 + $0x18] sm:$0xff] }
   0x5   :  { %v1086_v12 = vpack.c.bf16 %v86_v10, %v85_v9  ;;  %1055 = vmatpush3.bf16.msra.mxu0 %v1054_v7  ;;  %v1058_v17 = vpack.c.bf16 %v56_v15, %v55_v14  ;;  %v103_v18 = vld [vmem:[%s1945_s1 + $0x190] sm:$0xff]  ;;  %v104_v19 = vld [vmem:[%s1945_s1 + $0x198] sm:$0xff]  ;;  %v73_v23 = vld [vmem:[%s1945_s1 + $0xa0] sm:$0xff] }
   0x6   :  { %1085 = vmatprep.subr.bf16.mxu1 %v1084_v8  ;;  %v87_v20 = vld [vmem:[%s1945_s1 + $0x110] sm:$0xff]  ;;  %v1088_v21 = vpack.c.bf16 %v104_v19, %v103_v18  ;;  %v88_v22 = vld [vmem:[%s1945_s1 + $0x118] sm:$0xff]  ;;  %v74_v24 = vld [vmem:[%s1945_s1 + $0xa8] sm:$0xff]  ;;  %1057 = vmatprep.subr.bf16.mxu0 %v1056_v16 }
   0x7   :  { %1087 = vmatpush3.bf16.msra.mxu1 %v1086_v12  ;;  %v1090_v25 = vpack.c.bf16 %v88_v22, %v87_v20  ;;  %v1060_v26 = vpack.c.bf16 %v74_v24, %v73_v23  ;;  %v57_v27 = vld [vmem:[%s1945_s1 + $0x20] sm:$0xff]  ;;  %v58_v28 = vld [vmem:[%s1945_s1 + $0x28] sm:$0xff]  ;;  %v75_v35 = vld [vmem:[%s1945_s1 + $0xb0] sm:$0xff] }
   0x8   :  { %v105_v29 = vld [vmem:[%s1945_s1 + $0x1a0] sm:$0xff]  ;;  %1089 = vmatprep.subr.bf16.mxu1 %v1088_v21  ;;  %v106_v30 = vld [vmem:[%s1945_s1 + $0x1a8] sm:$0xff]  ;;  %v1062_v33 = vpack.c.bf16 %v58_v28, %v57_v27  ;;  %v76_v36 = vld [vmem:[%s1945_s1 + $0xb8] sm:$0xff] }
   0x9   :  { %v89_v31 = vld [vmem:[%s1945_s1 + $0x120] sm:$0xff]  ;;  %v90_v32 = vld [vmem:[%s1945_s1 + $0x128] sm:$0xff]  ;;  %1059 = vmatpush3.bf16.msra.mxu0 %v1058_v17  ;;  %v1092_v34 = vpack.c.bf16 %v106_v30, %v105_v29  ;;  %v59_v37 = vld [vmem:[%s1945_s1 + $0x30] sm:$0xff]  ;;  %v1064_v39 = vpack.c.bf16 %v76_v36, %v75_v35 }
   0xa   :  { %1061 = vmatprep.subr.bf16.mxu0 %v1060_v26  ;;  %v1094_v38 = vpack.c.bf16 %v90_v32, %v89_v31  ;;  %v60_v40 = vld [vmem:[%s1945_s1 + $0x38] sm:$0xff]  ;;  %v107_v41 = vld [vmem:[%s1945_s1 + $0x1b0] sm:$0xff]  ;;  %v77_v46 = vld [vmem:[%s1945_s1 + $0xc0] sm:$0xff] }
   0xb   :  { %1091 = vmatpush3.bf16.msra.mxu1 %v1090_v25  ;;  %v108_v42 = vld [vmem:[%s1945_s1 + $0x1b8] sm:$0xff]  ;;  %v91_v44 = vld [vmem:[%s1945_s1 + $0x130] sm:$0xff]  ;;  %v78_v47 = vld [vmem:[%s1945_s1 + $0xc8] sm:$0xff]  ;;  %v1066_v48 = vpack.c.bf16 %v60_v40, %v59_v37 }
   0xc   :  { %1093 = vmatprep.subr.bf16.mxu1 %v1092_v34  ;;  %v1096_v43 = vpack.c.bf16 %v108_v42, %v107_v41  ;;  %v92_v45 = vld [vmem:[%s1945_s1 + $0x138] sm:$0xff]  ;;  %v109_v49 = vld [vmem:[%s1945_s1 + $0x1c0] sm:$0xff]  ;;  %v110_v50 = vld [vmem:[%s1945_s1 + $0x1c8] sm:$0xff]  ;;  %v1068_v52 = vpack.c.bf16 %v78_v47, %v77_v46 }
   0xd   :  { %1063 = vmatpush3.bf16.msra.mxu0 %v1062_v33  ;;  %v1098_v51 = vpack.c.bf16 %v92_v45, %v91_v44  ;;  %v61_v53 = vld [vmem:[%s1945_s1 + $0x40] sm:$0xff]  ;;  %v62_v54 = vld [vmem:[%s1945_s1 + $0x48] sm:$0xff]  ;;  %v1100_v56 = vpack.c.bf16 %v110_v50, %v109_v49  ;;  %v79_v58 = vld [vmem:[%s1945_s1 + $0xd0] sm:$0xff] }
   0xe   :  { %1065 = vmatprep.subr.bf16.mxu0 %v1064_v39  ;;  %v93_v55 = vld [vmem:[%s1945_s1 + $0x140] sm:$0xff]  ;;  %v94_v57 = vld [vmem:[%s1945_s1 + $0x148] sm:$0xff]  ;;  %v80_v59 = vld [vmem:[%s1945_s1 + $0xd8] sm:$0xff]  ;;  %v1070_v62 = vpack.c.bf16 %v62_v54, %v61_v53 }
   0xf   :  { %1095 = vmatpush3.bf16.msra.mxu1 %v1094_v38  ;;  %v111_v60 = vld [vmem:[%s1945_s1 + $0x1d0] sm:$0xff]  ;;  %v112_v61 = vld [vmem:[%s1945_s1 + $0x1d8] sm:$0xff]  ;;  %v1102_v63 = vpack.c.bf16 %v94_v57, %v93_v55  ;;  %v1072_v0 = vpack.c.bf16 %v80_v59, %v79_v58  ;;  %v81_v6 = vld [vmem:[%s1945_s1 + $0xe0] sm:$0xff] }
  0x10   :  { %1097 = vmatprep.subr.bf16.mxu1 %v1096_v43  ;;  %v63_v1 = vld [vmem:[%s1945_s1 + $0x50] sm:$0xff]  ;;  %v64_v2 = vld [vmem:[%s1945_s1 + $0x58] sm:$0xff]  ;;  %v1104_v4 = vpack.c.bf16 %v112_v61, %v111_v60  ;;  %v82_v7 = vld [vmem:[%s1945_s1 + $0xe8] sm:$0xff] }
  0x11   :  { %1067 = vmatpush3.bf16.msra.mxu0 %v1066_v48  ;;  %v95_v3 = vld [vmem:[%s1945_s1 + $0x150] sm:$0xff]  ;;  %v96_v5 = vld [vmem:[%s1945_s1 + $0x158] sm:$0xff]  ;;  %v113_v8 = vld [vmem:[%s1945_s1 + $0x1e0] sm:$0xff]  ;;  %v1074_v10 = vpack.c.bf16 %v64_v2, %v63_v1  ;;  %v1076_v14 = vpack.c.bf16 %v82_v7, %v81_v6 }
  0x12   :  { %1069 = vmatprep.subr.bf16.mxu0 %v1068_v52  ;;  %v114_v9 = vld [vmem:[%s1945_s1 + $0x1e8] sm:$0xff]  ;;  %v65_v11 = vld [vmem:[%s1945_s1 + $0x60] sm:$0xff]  ;;  %v1106_v13 = vpack.c.bf16 %v96_v5, %v95_v3  ;;  %v83_v19 = vld [vmem:[%s1945_s1 + $0xf0] sm:$0xff] }
  0x13   :  { %1099 = vmatpush3.bf16.msra.mxu1 %v1098_v51  ;;  %v16_v12 = vld [vmem:[%s1946_s0 + $0x1] sm:$0xff]  ;;  %v1108_v18 = vpack.c.bf16 %v114_v9, %v113_v8  ;;  %v84_v20 = vld [vmem:[%s1945_s1 + $0xf8] sm:$0xff]  ;;  %v115_v22 = vld [vmem:[%s1945_s1 + $0x1f0] sm:$0xff] }
  0x14   :  { %1101 = vmatprep.subr.bf16.mxu1 %v1100_v56  ;;  %v66_v15 = vld [vmem:[%s1945_s1 + $0x68] sm:$0xff]  ;;  %v97_v16 = vld [vmem:[%s1945_s1 + $0x160] sm:$0xff]  ;;  %300 = vmatprep.mubr.f32.mxu0 %v16_v12  ;;  %v116_v23 = vld [vmem:[%s1945_s1 + $0x1f8] sm:$0xff]  ;;  %v1080_v26 = vpack.c.bf16 %v84_v20, %v83_v19 }
  0x15   :  { %1071 = vmatpush3.bf16.msra.mxu0 %v1070_v62  ;;  %v98_v17 = vld [vmem:[%s1945_s1 + $0x168] sm:$0xff]  ;;  %v1078_v24 = vpack.c.bf16 %v66_v15, %v65_v11  ;;  %v67_v27 = vld [vmem:[%s1945_s1 + $0x70] sm:$0xff]  ;;  %v68_v28 = vld [vmem:[%s1945_s1 + $0x78] sm:$0xff]  ;;  %v1112_v30 = vpack.c.bf16 %v116_v23, %v115_v22 }
  0x16   :  { %1073 = vmatprep.subr.bf16.mxu0 %v1072_v0  ;;  %v20_v21 = vld [vmem:[%s1946_s0 + $0x3] sm:$0xff]  ;;  %v1110_v25 = vpack.c.bf16 %v98_v17, %v97_v16  ;;  %v99_v29 = vld [vmem:[%s1945_s1 + $0x170] sm:$0xff]  ;;  %v100_v31 = vld [vmem:[%s1945_s1 + $0x178] sm:$0xff]  ;;  %v1082_v36 = vpack.c.bf16 %v68_v28, %v67_v27 }
  0x17   :  { %1103 = vmatpush3.bf16.msra.mxu1 %v1102_v63  ;;  %385 = vmatprep.mubr.f32.mxu1 %v20_v21  ;;  %v133_v32 = vld [vmem:[%s1945_s1 + $0x280] sm:$0xff]  ;;  %v134_v33 = vld [vmem:[%s1945_s1 + $0x288] sm:$0xff]  ;;  %v1114_v37 = vpack.c.bf16 %v100_v31, %v99_v29  ;;  %v135_v44 = vld [vmem:[%s1945_s1 + $0x290] sm:$0xff] }
  0x18   :  { %1105 = vmatprep.subr.bf16.mxu1 %v1104_v4  ;;  %v165_v34 = vld [vmem:[%s1945_s1 + $0x380] sm:$0xff]  ;;  %v166_v35 = vld [vmem:[%s1945_s1 + $0x388] sm:$0xff]  ;;  %v1116_v38 = vpack.c.bf16 %v134_v33, %v133_v32  ;;  %v136_v45 = vld [vmem:[%s1945_s1 + $0x298] sm:$0xff] }
  0x19   :  { %1075 = vmatpush3.bf16.msra.mxu0 %v1074_v10  ;;  %v117_v39 = vld [vmem:[%s1945_s1 + $0x200] sm:$0xff]  ;;  %v118_v40 = vld [vmem:[%s1945_s1 + $0x208] sm:$0xff]  ;;  %v1148_v42 = vpack.c.bf16 %v166_v35, %v165_v34  ;;  %v167_v46 = vld [vmem:[%s1945_s1 + $0x390] sm:$0xff]  ;;  %v1120_v52 = vpack.c.bf16 %v136_v45, %v135_v44 }
  0x1a   :  { %1077 = vmatprep.subr.bf16.mxu0 %v1076_v14  ;;  %v149_v41 = vld [vmem:[%s1945_s1 + $0x300] sm:$0xff]  ;;  %v150_v43 = vld [vmem:[%s1945_s1 + $0x308] sm:$0xff]  ;;  %v168_v47 = vld [vmem:[%s1945_s1 + $0x398] sm:$0xff]  ;;  %v1118_v49 = vpack.c.bf16 %v118_v40, %v117_v39 }
  0x1b   :  { %1107 = vmatpush3.bf16.msra.mxu1 %v1106_v13  ;;  %v14_v48 = vld [vmem:[%s1946_s0] sm:$0xff]  ;;  %v1150_v51 = vpack.c.bf16 %v150_v43, %v149_v41  ;;  %v119_v53 = vld [vmem:[%s1945_s1 + $0x210] sm:$0xff]  ;;  %v120_v54 = vld [vmem:[%s1945_s1 + $0x218] sm:$0xff]  ;;  %v1152_v56 = vpack.c.bf16 %v168_v47, %v167_v46 }
  0x1c   :  { %1109 = vmatprep.subr.bf16.mxu1 %v1108_v18  ;;  %v18_v50 = vld [vmem:[%s1946_s0 + $0x2] sm:$0xff]  ;;  %v151_v55 = vld [vmem:[%s1945_s1 + $0x310] sm:$0xff]  ;;  %v152_v57 = vld [vmem:[%s1945_s1 + $0x318] sm:$0xff]  ;;  %v1122_v63 = vpack.c.bf16 %v120_v54, %v119_v53 }
  0x1d   :  { %1079 = vmatpush3.bf16.msra.mxu0 %v1078_v24  ;;  %v137_v58 = vld [vmem:[%s1945_s1 + $0x2a0] sm:$0xff]  ;;  %v138_v59 = vld [vmem:[%s1945_s1 + $0x2a8] sm:$0xff]  ;;  %v1154_v3 = vpack.c.bf16 %v152_v57, %v151_v55  ;;  %v139_v9 = vld [vmem:[%s1945_s1 + $0x2b0] sm:$0xff] }
  0x1e   :  { %1081 = vmatprep.subr.bf16.mxu0 %v1080_v26  ;;  %v169_v60 = vld [vmem:[%s1945_s1 + $0x3a0] sm:$0xff]  ;;  %v170_v61 = vld [vmem:[%s1945_s1 + $0x3a8] sm:$0xff]  ;;  %v1124_v4 = vpack.c.bf16 %v138_v59, %v137_v58  ;;  %v140_v10 = vld [vmem:[%s1945_s1 + $0x2b8] sm:$0xff] }
  0x1f   :  { %1111 = vmatpush3.bf16.msra.mxu1 %v1110_v25  ;;  %v1531_v62 = vld [vmem:[%s1946_s0 + $0x9] sm:$0xff]  ;;  %v121_v0 = vld [vmem:[%s1945_s1 + $0x220] sm:$0xff]  ;;  %v1156_v8 = vpack.c.bf16 %v170_v61, %v169_v60  ;;  %v172_v13 = vld [vmem:[%s1945_s1 + $0x3b8] sm:$0xff]  ;;  %v1128_v20 = vpack.c.bf16 %v140_v10, %v139_v9 }
  0x20   :  { %1113 = vmatprep.subr.bf16.mxu1 %v1112_v30  ;;  %v122_v1 = vld [vmem:[%s1945_s1 + $0x228] sm:$0xff]  ;;  %v153_v5 = vld [vmem:[%s1945_s1 + $0x320] sm:$0xff]  ;;  %v171_v12 = vld [vmem:[%s1945_s1 + $0x3b0] sm:$0xff] }
  0x21   :  { %1083 = vmatpush3.bf16.msra.mxu0 %v1082_v36  ;;  %v1542_v2 = vld [vmem:[%s1946_s0 + $0x8] sm:$0xff]  ;;  %v1126_v15 = vpack.c.bf16 %v122_v1, %v121_v0  ;;  %v123_v16 = vld [vmem:[%s1945_s1 + $0x230] sm:$0xff]  ;;  %v124_v17 = vld [vmem:[%s1945_s1 + $0x238] sm:$0xff]  ;;  %v1160_v24 = vpack.c.bf16 %v172_v13, %v171_v12 }
  0x22   :  { %1117 = vmatprep.subr.bf16.mxu0 %v1116_v38  ;;  %v154_v6 = vld [vmem:[%s1945_s1 + $0x328] sm:$0xff]  ;;  %v754_v18 = vld [vmem:[%s1946_s0 + $0x20] sm:$0xff]  ;;  %v155_v21 = vld [vmem:[%s1945_s1 + $0x330] sm:$0xff]  ;;  %v1130_v31 = vpack.c.bf16 %v124_v17, %v123_v16 }
  0x23   :  { %1115 = vmatpush3.bf16.msra.mxu1 %v1114_v37  ;;  %v21_v7 = vld [vmem:[%s1946_s0 + $0xb] sm:$0xff]  ;;  %v756_v14 = vld [vmem:[%s1946_s0 + $0x21] sm:$0xff]  ;;  %v1158_v19 = vpack.c.bf16 %v154_v6, %v153_v5  ;;  %v156_v22 = vld [vmem:[%s1945_s1 + $0x338] sm:$0xff] }
  0x24   :  { %1149 = vmatprep.subr.bf16.mxu1 %v1148_v42  ;;  %301 = vmatmul.mubr.f32.vlgmr.msra.gmra.mrb[0].mxu0 %v14_v48  ;;  %v1563_v11 = vld [vmem:[%s1946_s0 + $0xa] sm:$0xff]  ;;  %v141_v25 = vld [vmem:[%s1945_s1 + $0x2c0] sm:$0xff]  ;;  %v1162_v35 = vpack.c.bf16 %v156_v22, %v155_v21  ;;  %v144_v42 = vld [vmem:[%s1945_s1 + $0x2d8] sm:$0xff] }
  0x25   :  { %1119 = vmatpush3.bf16.msra.mxu0 %v1118_v49  ;;  %305 = vmatprep.mubr.f32.mxu0 %v1531_v62  ;;  %v760_v23 = vld [vmem:[%s1946_s0 + $0x23] sm:$0xff]  ;;  %v761_v39 = vld [vmem:[%s1946_s0 + $0x2b] sm:$0xff]  ;;  %v176_v45 = vld [vmem:[%s1945_s1 + $0x3d8] sm:$0xff] }
  0x26   :  { %386 = vmatmul.mubr.f32.vlgmr.msra.gmra.mrb[0].mxu1 %v18_v50  ;;  %1121 = vmatprep.subr.bf16.mxu0 %v1120_v52  ;;  %v142_v26 = vld [vmem:[%s1945_s1 + $0x2c8] sm:$0xff]  ;;  %v173_v28 = vld [vmem:[%s1945_s1 + $0x3c0] sm:$0xff]  ;;  %v143_v41 = vld [vmem:[%s1945_s1 + $0x2d0] sm:$0xff] }
  0x27   :  { %1151 = vmatpush3.bf16.msra.mxu1 %v1150_v51  ;;  %390 = vmatprep.mubr.f32.mxu1 %v21_v7  ;;  %v758_v27 = vld [vmem:[%s1946_s0 + $0x22] sm:$0xff]  ;;  %v1132_v36 = vpack.c.bf16 %v142_v26, %v141_v25  ;;  %v1644_v43 = vld [vmem:[%s1946_s0 + $0x2a] sm:$0xff]  ;;  %v1136_v50 = vpack.c.bf16 %v144_v42, %v143_v41  ;;  %v128_v51 = vld [vmem:[%s1945_s1 + $0x258] sm:$0xff] }
  0x28   :  { %1153 = vmatprep.subr.bf16.mxu1 %v1152_v56  ;;  %306 = vmatmul.mubr.f32.gmra.mrb[2].mxu0 %v1542_v2  ;;  %v174_v29 = vld [vmem:[%s1945_s1 + $0x3c8] sm:$0xff]  ;;  %v125_v32 = vld [vmem:[%s1945_s1 + $0x240] sm:$0xff]  ;;  %v175_v44 = vld [vmem:[%s1945_s1 + $0x3d0] sm:$0xff] }
  0x29   :  { %1123 = vmatpush3.bf16.msra.mxu0 %v1122_v63  ;;  %310 = vmatprep.mubr.f32.mxu0 %v756_v14  ;;  %v1612_v30 = vld [vmem:[%s1946_s0 + $0x29] sm:$0xff]  ;;  %v157_v37 = vld [vmem:[%s1945_s1 + $0x340] sm:$0xff]  ;;  %v1164_v40 = vpack.c.bf16 %v174_v29, %v173_v28  ;;  %v1168_v54 = vpack.c.bf16 %v176_v45, %v175_v44  ;;  %v160_v55 = vld [vmem:[%s1945_s1 + $0x358] sm:$0xff] }
  0x2a   :  { %391 = vmatmul.mubr.f32.gmra.mrb[2].mxu1 %v1563_v11  ;;  %1125 = vmatprep.subr.bf16.mxu0 %v1124_v4  ;;  %v126_v33 = vld [vmem:[%s1945_s1 + $0x248] sm:$0xff]  ;;  %v127_v48 = vld [vmem:[%s1945_s1 + $0x250] sm:$0xff]  ;;  %v145_v56 = vld [vmem:[%s1945_s1 + $0x2e0] sm:$0xff] }
  0x2b   :  { %1155 = vmatpush3.bf16.msra.mxu1 %v1154_v3  ;;  %395 = vmatprep.mubr.f32.mxu1 %v760_v23  ;;  %v1623_v34 = vld [vmem:[%s1946_s0 + $0x28] sm:$0xff]  ;;  %v1134_v47 = vpack.c.bf16 %v126_v33, %v125_v32  ;;  %v159_v52 = vld [vmem:[%s1945_s1 + $0x350] sm:$0xff]  ;;  %v177_v58 = vld [vmem:[%s1945_s1 + $0x3e0] sm:$0xff]  ;;  %v1138_v60 = vpack.c.bf16 %v128_v51, %v127_v48 }
  0x2c   :  { %1157 = vmatprep.subr.bf16.mxu1 %v1156_v8  ;;  %311 = vmatmul.mubr.f32.gmra.mrb[4].mxu0 %v754_v18  ;;  %v158_v38 = vld [vmem:[%s1945_s1 + $0x348] sm:$0xff]  ;;  %v1170_v61 = vpack.c.bf16 %v160_v55, %v159_v52  ;;  %v129_v0 = vld [vmem:[%s1945_s1 + $0x260] sm:$0xff]  ;;  %v147_v6 = vld [vmem:[%s1945_s1 + $0x2f0] sm:$0xff] }
  0x2d   :  { %1127 = vmatpush3.bf16.msra.mxu0 %v1126_v15  ;;  %315 = vmatprep.mubr.f32.mxu0 %v1612_v30  ;;  %v24_v46 = vld [vmem:[%s1946_s0 + $0x5] sm:$0xff]  ;;  %v1166_v49 = vpack.c.bf16 %v158_v38, %v157_v37  ;;  %v148_v7 = vld [vmem:[%s1945_s1 + $0x2f8] sm:$0xff]  ;;  %v179_v8 = vld [vmem:[%s1945_s1 + $0x3f0] sm:$0xff] }
  0x2e   :  { %396 = vmatmul.mubr.f32.gmra.mrb[4].mxu1 %v758_v27  ;;  %1129 = vmatprep.subr.bf16.mxu0 %v1128_v20  ;;  %v28_v53 = vld [vmem:[%s1946_s0 + $0x7] sm:$0xff]  ;;  %v180_v9 = vld [vmem:[%s1945_s1 + $0x3f8] sm:$0xff]  ;;  %v1144_v13 = vpack.c.bf16 %v148_v7, %v147_v6  ;;  %v131_v14 = vld [vmem:[%s1945_s1 + $0x270] sm:$0xff] }
  0x2f   :  { %1159 = vmatpush3.bf16.msra.mxu1 %v1158_v19  ;;  %400 = vmatprep.mubr.f32.mxu1 %v761_v39  ;;  %v146_v57 = vld [vmem:[%s1945_s1 + $0x2e8] sm:$0xff]  ;;  %v161_v3 = vld [vmem:[%s1945_s1 + $0x360] sm:$0xff]  ;;  %v132_v15 = vld [vmem:[%s1945_s1 + $0x278] sm:$0xff]  ;;  %v1176_v17 = vpack.c.bf16 %v180_v9, %v179_v8 }
  0x30   :  { %1161 = vmatprep.subr.bf16.mxu1 %v1160_v24  ;;  %316 = vmatmul.mubr.f32.gmra.mrb[6].mxu0 %v1623_v34  ;;  %v178_v59 = vld [vmem:[%s1945_s1 + $0x3e8] sm:$0xff]  ;;  %v1140_v63 = vpack.c.bf16 %v146_v57, %v145_v56  ;;  %v163_v16 = vld [vmem:[%s1945_s1 + $0x370] sm:$0xff]  ;;  %v164_v18 = vld [vmem:[%s1945_s1 + $0x378] sm:$0xff]  ;;  %v1146_v23 = vpack.c.bf16 %v132_v15, %v131_v14 }
  0x31   :  { %1131 = vmatpush3.bf16.msra.mxu0 %v1130_v31  ;;  %470 = vmatprep.mubr.f32.mxu0 %v24_v46  ;;  %v130_v1 = vld [vmem:[%s1945_s1 + $0x268] sm:$0xff]  ;;  %v1172_v4 = vpack.c.bf16 %v178_v59, %v177_v58  ;;  %v197_v19 = vld [vmem:[%s1945_s1 + $0x480] sm:$0xff]  ;;  %v1178_v24 = vpack.c.bf16 %v164_v18, %v163_v16  ;;  %v199_v28 = vld [vmem:[%s1945_s1 + $0x490] sm:$0xff] }
  0x32   :  { %401 = vmatmul.mubr.f32.gmra.mrb[6].mxu1 %v1644_v43  ;;  %1133 = vmatprep.subr.bf16.mxu0 %v1132_v36  ;;  %v162_v5 = vld [vmem:[%s1945_s1 + $0x368] sm:$0xff]  ;;  %v1142_v10 = vpack.c.bf16 %v130_v1, %v129_v0  ;;  %v213_v21 = vld [vmem:[%s1945_s1 + $0x500] sm:$0xff]  ;;  %v200_v29 = vld [vmem:[%s1945_s1 + $0x498] sm:$0xff] }
  0x33   :  { %1163 = vmatpush3.bf16.msra.mxu1 %v1162_v35  ;;  %555 = vmatprep.mubr.f32.mxu1 %v28_v53  ;;  %v1174_v12 = vpack.c.bf16 %v162_v5, %v161_v3  ;;  %v198_v20 = vld [vmem:[%s1945_s1 + $0x488] sm:$0xff]  ;;  %v181_v26 = vld [vmem:[%s1945_s1 + $0x400] sm:$0xff]  ;;  %v215_v35 = vld [vmem:[%s1945_s1 + $0x510] sm:$0xff]  ;;  %v1184_v38 = vpack.c.bf16 %v200_v29, %v199_v28 }
  0x34   :  { %1165 = vmatprep.subr.bf16.mxu1 %v1164_v40  ;;  %v214_v22 = vld [vmem:[%s1945_s1 + $0x508] sm:$0xff]  ;;  %v1180_v25 = vpack.c.bf16 %v198_v20, %v197_v19  ;;  %v216_v36 = vld [vmem:[%s1945_s1 + $0x518] sm:$0xff]  ;;  %v183_v39 = vld [vmem:[%s1945_s1 + $0x410] sm:$0xff] }
  0x35   :  { %1135 = vmatpush3.bf16.msra.mxu0 %v1134_v47  ;;  %v182_v27 = vld [vmem:[%s1945_s1 + $0x408] sm:$0xff]  ;;  %v1212_v31 = vpack.c.bf16 %v214_v22, %v213_v21  ;;  %v184_v40 = vld [vmem:[%s1945_s1 + $0x418] sm:$0xff]  ;;  %v201_v42 = vld [vmem:[%s1945_s1 + $0x4a0] sm:$0xff]  ;;  %v1216_v46 = vpack.c.bf16 %v216_v36, %v215_v35 }
  0x36   :  { %1137 = vmatprep.subr.bf16.mxu0 %v1136_v50  ;;  %v22_v32 = vld [vmem:[%s1946_s0 + $0x4] sm:$0xff]  ;;  %v1182_v33 = vpack.c.bf16 %v182_v27, %v181_v26  ;;  %v25_v41 = vld [vmem:[%s1946_s0 + $0xd] sm:$0xff]  ;;  %v1186_v48 = vpack.c.bf16 %v184_v40, %v183_v39  ;;  %v204_v57 = vld [vmem:[%s1945_s1 + $0x4b8] sm:$0xff] }
  0x37   :  { %1167 = vmatpush3.bf16.msra.mxu1 %v1166_v49  ;;  %v26_v37 = vld [vmem:[%s1946_s0 + $0x6] sm:$0xff]  ;;  %v29_v45 = vld [vmem:[%s1946_s0 + $0xf] sm:$0xff]  ;;  %v220_v0 = vld [vmem:[%s1945_s1 + $0x538] sm:$0xff] }
  0x38   :  { %1169 = vmatprep.subr.bf16.mxu1 %v1168_v54  ;;  %v202_v44 = vld [vmem:[%s1945_s1 + $0x4a8] sm:$0xff]  ;;  %v217_v49 = vld [vmem:[%s1945_s1 + $0x520] sm:$0xff]  ;;  %v203_v56 = vld [vmem:[%s1945_s1 + $0x4b0] sm:$0xff] }
  0x39   :  { %1139 = vmatpush3.bf16.msra.mxu0 %v1138_v60  ;;  %v23_v47 = vld [vmem:[%s1946_s0 + $0xc] sm:$0xff]  ;;  %v1188_v52 = vpack.c.bf16 %v202_v44, %v201_v42  ;;  %v185_v53 = vld [vmem:[%s1945_s1 + $0x420] sm:$0xff]  ;;  %v1192_v3 = vpack.c.bf16 %v204_v57, %v203_v56  ;;  %v188_v5 = vld [vmem:[%s1945_s1 + $0x438] sm:$0xff] }
  0x3a   :  { %1141 = vmatprep.subr.bf16.mxu0 %v1140_v63  ;;  %v218_v50 = vld [vmem:[%s1945_s1 + $0x528] sm:$0xff]  ;;  %v219_v63 = vld [vmem:[%s1945_s1 + $0x530] sm:$0xff]  ;;  %v205_v7 = vld [vmem:[%s1945_s1 + $0x4c0] sm:$0xff] }
  0x3b   :  { %1171 = vmatpush3.bf16.msra.mxu1 %v1170_v61  ;;  %v27_v51 = vld [vmem:[%s1946_s0 + $0xe] sm:$0xff]  ;;  %v764_v55 = vld [vmem:[%s1946_s0 + $0x25] sm:$0xff]  ;;  %v1220_v59 = vpack.c.bf16 %v218_v50, %v217_v49  ;;  %v208_v21 = vld [vmem:[%s1945_s1 + $0x4d8] sm:$0xff] }
  0x3c   :  { %1173 = vmatprep.subr.bf16.mxu1 %v1172_v4  ;;  %v186_v54 = vld [vmem:[%s1945_s1 + $0x428] sm:$0xff]  ;;  %v187_v4 = vld [vmem:[%s1945_s1 + $0x430] sm:$0xff]  ;;  %v221_v14 = vld [vmem:[%s1945_s1 + $0x540] sm:$0xff] }
  0x3d   :  { %1143 = vmatpush3.bf16.msra.mxu0 %v1142_v10  ;;  %v768_v58 = vld [vmem:[%s1946_s0 + $0x27] sm:$0xff]  ;;  %v1190_v61 = vpack.c.bf16 %v186_v54, %v185_v53  ;;  %v769_v9 = vld [vmem:[%s1946_s0 + $0x2f] sm:$0xff]  ;;  %v1224_v10 = vpack.c.bf16 %v220_v0, %v219_v63  ;;  %v192_v28 = vld [vmem:[%s1945_s1 + $0x458] sm:$0xff] }
  0x3e   :  { %1145 = vmatprep.subr.bf16.mxu0 %v1144_v13  ;;  %v762_v60 = vld [vmem:[%s1946_s0 + $0x24] sm:$0xff]  ;;  %v765_v6 = vld [vmem:[%s1946_s0 + $0x2d] sm:$0xff]  ;;  %v1194_v13 = vpack.c.bf16 %v188_v5, %v187_v4  ;;  %v212_v39 = vld [vmem:[%s1945_s1 + $0x4f8] sm:$0xff] }
  0x3f   :  { %1175 = vmatpush3.bf16.msra.mxu1 %v1174_v12  ;;  %v766_v1 = vld [vmem:[%s1946_s0 + $0x26] sm:$0xff]  ;;  %v767_v16 = vld [vmem:[%s1946_s0 + $0x2e] sm:$0xff]  ;;  %v228_v44 = vld [vmem:[%s1945_s1 + $0x578] sm:$0xff] }
  0x40   :  { %1177 = vmatprep.subr.bf16.mxu1 %v1176_v17  ;;  %v206_v8 = vld [vmem:[%s1945_s1 + $0x4c8] sm:$0xff]  ;;  %v189_v18 = vld [vmem:[%s1945_s1 + $0x440] sm:$0xff]  ;;  %v207_v20 = vld [vmem:[%s1945_s1 + $0x4d0] sm:$0xff] }
  0x41   :  { %1147 = vmatpush3.bf16.msra.mxu0 %v1146_v23  ;;  %v763_v12 = vld [vmem:[%s1946_s0 + $0x2c] sm:$0xff]  ;;  %v1196_v17 = vpack.c.bf16 %v206_v8, %v205_v7  ;;  %v1200_v26 = vpack.c.bf16 %v208_v21, %v207_v20  ;;  %v209_v29 = vld [vmem:[%s1945_s1 + $0x4e0] sm:$0xff] }
  0x42   :  { %1181 = vmatprep.subr.bf16.mxu0 %v1180_v25  ;;  %v222_v15 = vld [vmem:[%s1945_s1 + $0x548] sm:$0xff]  ;;  %v224_v25 = vld [vmem:[%s1945_s1 + $0x558] sm:$0xff]  ;;  %v191_v27 = vld [vmem:[%s1945_s1 + $0x450] sm:$0xff] }
  0x43   :  { %1179 = vmatpush3.bf16.msra.mxu1 %v1178_v24  ;;  %v190_v19 = vld [vmem:[%s1945_s1 + $0x448] sm:$0xff]  ;;  %v1228_v22 = vpack.c.bf16 %v222_v15, %v221_v14  ;;  %v223_v24 = vld [vmem:[%s1945_s1 + $0x550] sm:$0xff]  ;;  %v225_v35 = vld [vmem:[%s1945_s1 + $0x560] sm:$0xff] }
  0x44   :  { %1213 = vmatprep.subr.bf16.mxu1 %v1212_v31  ;;  %471 = vmatmul.mubr.f32.vlgmr.msra.gmra.mrb[8].mxu0 %v22_v32  ;;  %v1198_v23 = vpack.c.bf16 %v190_v19, %v189_v18  ;;  %v1232_v32 = vpack.c.bf16 %v224_v25, %v223_v24  ;;  %v227_v42 = vld [vmem:[%s1945_s1 + $0x570] sm:$0xff] }
  0x45   :  { %1183 = vmatpush3.bf16.msra.mxu0 %v1182_v33  ;;  %475 = vmatprep.mubr.f32.mxu0 %v25_v41  ;;  %v1202_v33 = vpack.c.bf16 %v192_v28, %v191_v27  ;;  %v31_v50 = vld [vmem:[%s1946_s0 + $0x11] sm:$0xff] }
  0x46   :  { %556 = vmatmul.mubr.f32.vlgmr.msra.gmra.mrb[8].mxu1 %v26_v37  ;;  %1185 = vmatprep.subr.bf16.mxu0 %v1184_v38  ;;  %v193_v37 = vld [vmem:[%s1945_s1 + $0x460] sm:$0xff]  ;;  %v211_v38 = vld [vmem:[%s1945_s1 + $0x4f0] sm:$0xff] }
  0x47   :  { %560 = vmatprep.mubr.f32.mxu1 %v29_v45  ;;  %1215 = vmatpush3.bf16.msra.mxu1 %v1212_v31  ;;  %v210_v31 = vld [vmem:[%s1945_s1 + $0x4e8] sm:$0xff]  ;;  %v1208_v45 = vpack.c.bf16 %v212_v39, %v211_v38  ;;  %v772_v53 = vld [vmem:[%s1946_s0 + $0x32] sm:$0xff] }
  0x48   :  { %476 = vmatmul.mubr.f32.gmra.mrb[10].mxu0 %v23_v47  ;;  %1217 = vmatprep.subr.bf16.mxu1 %v1216_v46  ;;  %v1204_v36 = vpack.c.bf16 %v210_v31, %v209_v29  ;;  %v196_v47 = vld [vmem:[%s1945_s1 + $0x478] sm:$0xff] }
  0x49   :  { %1187 = vmatpush3.bf16.msra.mxu0 %v1186_v48  ;;  %480 = vmatprep.mubr.f32.mxu0 %v764_v55  ;;  %v1240_v48 = vpack.c.bf16 %v228_v44, %v227_v42  ;;  %v771_v54 = vld [vmem:[%s1946_s0 + $0x31] sm:$0xff]  ;;  %v773_v55 = vld [vmem:[%s1947_s2] ss:$0 sm:$0xff] }
  0x4a   :  { %561 = vmatmul.mubr.f32.gmra.mrb[10].mxu1 %v27_v51  ;;  %1189 = vmatprep.subr.bf16.mxu0 %v1188_v52  ;;  %v32_v51 = vld [vmem:[%s1946_s0 + $0x12] sm:$0xff] }
  0x4b   :  { %565 = vmatprep.mubr.f32.mxu1 %v768_v58  ;;  %1219 = vmatpush3.bf16.msra.mxu1 %v1216_v46  ;;  %v195_v46 = vld [vmem:[%s1945_s1 + $0x470] sm:$0xff] }
  0x4c   :  { %481 = vmatmul.mubr.f32.gmra.mrb[12].mxu0 %v762_v60  ;;  %1221 = vmatprep.subr.bf16.mxu1 %v1220_v59  ;;  %v1210_v49 = vpack.c.bf16 %v196_v47, %v195_v46  ;;  %v30_v52 = vld [vmem:[%s1946_s0 + $0x10] sm:$0xff] }
  0x4d   :  { %1191 = vmatpush3.bf16.msra.mxu0 %v1190_v61  ;;  %485 = vmatprep.mubr.f32.mxu0 %v765_v6 }
  0x4e   :  { %566 = vmatmul.mubr.f32.gmra.mrb[12].mxu1 %v766_v1  ;;  %1193 = vmatprep.subr.bf16.mxu0 %v1192_v3 }
  0x4f   :  { %570 = vmatprep.mubr.f32.mxu1 %v769_v9  ;;  %1223 = vmatpush3.bf16.msra.mxu1 %v1220_v59 }
  0x50   :  { %486 = vmatmul.mubr.f32.gmra.mrb[14].mxu0 %v763_v12  ;;  %1225 = vmatprep.subr.bf16.mxu1 %v1224_v10 }
  0x51   :  { %1195 = vmatpush3.bf16.msra.mxu0 %v1194_v13  ;;  %640 = vmatprep.mubr.f32.mxu0 %v1531_v62  ;;  %v226_v62 = vld [vmem:[%s1945_s1 + $0x568] sm:$0xff] }
  0x52   :  { %571 = vmatmul.mubr.f32.gmra.mrb[14].mxu1 %v767_v16  ;;  %1197 = vmatprep.subr.bf16.mxu0 %v1196_v17  ;;  %v1236_v40 = vpack.c.bf16 %v226_v62, %v225_v35 }
  0x53   :  { %1227 = vmatpush3.bf16.msra.mxu1 %v1224_v10  ;;  %1046 = vmatprep.mubr.f32.mxu1 %v1563_v11  ;;  %v194_v11 = vld [vmem:[%s1945_s1 + $0x468] sm:$0xff] }
  0x54   :  { %1229 = vmatprep.subr.bf16.mxu1 %v1228_v22  ;;  %v1206_v41 = vpack.c.bf16 %v194_v11, %v193_v37 }
  0x55   :  { %1199 = vmatpush3.bf16.msra.mxu0 %v1198_v23 }
  0x56   :  { %1201 = vmatprep.subr.bf16.mxu0 %v1200_v26 }
  0x57   :  { %1231 = vmatpush3.bf16.msra.mxu1 %v1228_v22 }
  0x58   :  { %1233 = vmatprep.subr.bf16.mxu1 %v1232_v32 }
  0x59   :  { %1203 = vmatpush3.bf16.msra.mxu0 %v1202_v33 }
  0x5a   :  { %1205 = vmatprep.subr.bf16.mxu0 %v1204_v36 }
  0x5b   :  { %1235 = vmatpush3.bf16.msra.mxu1 %v1232_v32 }
  0x5c   :  { %1237 = vmatprep.subr.bf16.mxu1 %v1236_v40 }
  0x5d   :  { %1207 = vmatpush3.bf16.msra.mxu0 %v1206_v41 }
  0x5e   :  { %1209 = vmatprep.subr.bf16.mxu0 %v1208_v45 }
  0x5f   :  { %1239 = vmatpush3.bf16.msra.mxu1 %v1236_v40 }
  0x60   :  { %1241 = vmatprep.subr.bf16.mxu1 %v1240_v48 }
  0x61   :  { %1211 = vmatpush3.bf16.msra.mxu0 %v1210_v49 }
  0x63   :  { %1243 = vmatpush3.bf16.msra.mxu1 %v1240_v48 }
  0x64   :  { %641 = vmatmul.mubr.f32.vlgmr.msra.gmra.mrb[16].mxu0 %v1542_v2  ;;  %v770_v2 = vld [vmem:[%s1946_s0 + $0x30] sm:$0xff] }
  0x65   :  { %645 = vmatprep.mubr.f32.mxu0 %v31_v50 }
  0x66   :  { %1047 = vmatmul.mubr.f32.vlgmr.msra.gmra.mrb[16].mxu1 %v32_v51 }
  0x67   :  { %1049 = vmatprep.mubr.f32.mxu1 %v1644_v43 }
  0x68   :  { %646 = vmatmul.mubr.f32.gmra.mrb[18].mxu0 %v30_v52 }
  0x69   :  { %650 = vmatprep.mubr.f32.mxu0 %v1612_v30 }
  0x6a   :  { %1050 = vmatmul.mubr.f32.gmra.mrb[18].mxu1 %v772_v53 }
  0x6c   :  { %651 = vmatmul.mubr.f32.gmra.mrb[20].mxu0 %v1623_v34 }
  0x6d   :  { %655 = vmatprep.mubr.f32.mxu0 %v771_v54 }
  0x70   :  { %656 = vmatmul.mubr.f32.gmra.mrb[22].mxu0 %v770_v2 }
  0xf7   :  { %v806_v43 = vpop.f32.mrb[0].mxu0 }
  0xf8   :  { %v807_v56 = vpop.f32.mrb[1].mxu0 }
  0xf9   :  { %v850_v30 = vpop.f32.mrb[0].mxu1  ;;  %v808_v57 = vadd.f32 %v807_v56, %v806_v43 }
  0xfa   :  { %v851_v58 = vpop.f32.mrb[1].mxu1 }
  0xfb   :  { %v852_v59 = vadd.f32 %v851_v58, %v850_v30  ;;  %v303_v60 = vadd.f32 %v808_v57, %v773_v55  ;;  %v809_v61 = vpop.f32.mrb[2].mxu0 }
  0xfc   :  { %v810_v63 = vpop.f32.mrb[3].mxu0 }
  0xfd   :  { %v853_v34 = vpop.f32.mrb[2].mxu1  ;;  %v388_v0 = vadd.f32 %v852_v59, %v303_v60  ;;  %v811_v1 = vadd.f32 %v810_v63, %v809_v61 }
  0xfe   :  { %v854_v3 = vpop.f32.mrb[3].mxu1 }
  0xff   :  { %v855_v4 = vadd.f32 %v854_v3, %v853_v34  ;;  %v308_v5 = vadd.f32 %v811_v1, %v773_v55  ;;  %v812_v6 = vpop.f32.mrb[4].mxu0 }
 0x100   :  { %v813_v7 = vpop.f32.mrb[5].mxu0 }
 0x101   :  { %v856_v8 = vpop.f32.mrb[4].mxu1  ;;  %v393_v9 = vadd.f32 %v855_v4, %v308_v5  ;;  %v814_v10 = vadd.f32 %v813_v7, %v812_v6 }
 0x102   :  { %v857_v12 = vpop.f32.mrb[5].mxu1 }
 0x103   :  { %v858_v13 = vadd.f32 %v857_v12, %v856_v8  ;;  %v313_v14 = vadd.f32 %v814_v10, %v773_v55  ;;  %v815_v15 = vpop.f32.mrb[6].mxu0 }
 0x104   :  { %v816_v16 = vpop.f32.mrb[7].mxu0 }
 0x105   :  { %v859_v17 = vpop.f32.mrb[6].mxu1  ;;  %v398_v18 = vadd.f32 %v858_v13, %v313_v14  ;;  %v817_v19 = vadd.f32 %v816_v16, %v815_v15 }
 0x106   :  { %v860_v20 = vpop.f32.mrb[7].mxu1 }
 0x107   :  { %v861_v21 = vadd.f32 %v860_v20, %v859_v17  ;;  %v318_v22 = vadd.f32 %v817_v19, %v773_v55 }
 0x109   :  { %v403_v23 = vadd.f32 %v861_v21, %v318_v22 }
 0x117   :  { %v894_v24 = vpop.f32.mrb[8].mxu0 }
 0x118   :  { %v895_v25 = vpop.f32.mrb[9].mxu0 }
 0x119   :  { %v938_v26 = vpop.f32.mrb[8].mxu1  ;;  %v896_v27 = vadd.f32 %v895_v25, %v894_v24 }
 0x11a   :  { %v939_v28 = vpop.f32.mrb[9].mxu1 }
 0x11b   :  { %v940_v29 = vadd.f32 %v939_v28, %v938_v26  ;;  %v473_v31 = vadd.f32 %v896_v27, %v388_v0  ;;  %v897_v32 = vpop.f32.mrb[10].mxu0 }
 0x11c   :  { %v898_v33 = vpop.f32.mrb[11].mxu0 }
 0x11d   :  { %v941_v35 = vpop.f32.mrb[10].mxu1  ;;  %v558_v62 = vadd.f32 %v940_v29, %v473_v31  ;;  %v899_v36 = vadd.f32 %v898_v33, %v897_v32 }
 0x11e   :  { %v942_v37 = vpop.f32.mrb[11].mxu1 }
 0x11f   :  { %v943_v11 = vadd.f32 %v942_v37, %v941_v35  ;;  %v478_v38 = vadd.f32 %v899_v36, %v393_v9  ;;  %v900_v39 = vpop.f32.mrb[12].mxu0 }
 0x120   :  { %v901_v40 = vpop.f32.mrb[13].mxu0 }
 0x121   :  { %v944_v41 = vpop.f32.mrb[12].mxu1  ;;  %v563_v42 = vadd.f32 %v943_v11, %v478_v38  ;;  %v902_v44 = vadd.f32 %v901_v40, %v900_v39 }
 0x122   :  { %v945_v45 = vpop.f32.mrb[13].mxu1 }
 0x123   :  { %v946_v46 = vadd.f32 %v945_v45, %v944_v41  ;;  %v483_v47 = vadd.f32 %v902_v44, %v398_v18  ;;  %v903_v48 = vpop.f32.mrb[14].mxu0 }
 0x124   :  { %v904_v49 = vpop.f32.mrb[15].mxu0 }
 0x125   :  { %v947_v50 = vpop.f32.mrb[14].mxu1  ;;  %v568_v51 = vadd.f32 %v946_v46, %v483_v47  ;;  %v905_v52 = vadd.f32 %v904_v49, %v903_v48 }
 0x126   :  { %v948_v53 = vpop.f32.mrb[15].mxu1 }
 0x127   :  { %v949_v54 = vadd.f32 %v948_v53, %v947_v50  ;;  %v488_v2 = vadd.f32 %v905_v52, %v403_v23 }
 0x129   :  { %v573_v43 = vadd.f32 %v949_v54, %v488_v2 }
 0x137   :  { %v982_v55 = vpop.f32.mrb[16].mxu0 }
 0x138   :  { %v983_v56 = vpop.f32.mrb[17].mxu0 }
 0x139   :  { %v984_v30 = vadd.f32 %v983_v56, %v982_v55  ;;  %v1048_v57 = vpop.f32.mrb[16].mxu1 }
 0x13a   :  { %v727_v58 = vpop.f32.mrb[17].mxu1 }
 0x13b   :  { %v985_v59 = vpop.f32.mrb[18].mxu0  ;;  %v643_v60 = vadd.f32 %v984_v30, %v558_v62 }
 0x13c   :  { %v986_v61 = vpop.f32.mrb[19].mxu0 }
 0x13d   :  { %v987_v63 = vadd.f32 %v986_v61, %v985_v59  ;;  %v728_v34 = vadd.f32 %v727_v58, %v643_v60  ;;  %v1051_v0 = vpop.f32.mrb[18].mxu1 }
 0x13e   :  { %v737_v1 = vpop.f32.mrb[19].mxu1 }
 0x13f   :  { %v648_v3 = vadd.f32 %v987_v63, %v563_v42  ;;  %746 = vst [vmem:[%s1948_s3] sm:$0xff] %v728_v34  ;;  %v988_v4 = vpop.f32.mrb[20].mxu0 }
 0x140   :  { %v989_v5 = vpop.f32.mrb[21].mxu0 }
 0x141   :  { %v733_v6 = vadd.f32 %v1048_v57, %v648_v3  ;;  %v990_v7 = vadd.f32 %v989_v5, %v988_v4 }
 0x143   :  { %747 = vst [vmem:[%s1948_s3 + $0x8] sm:$0xff] %v733_v6  ;;  %v991_v8 = vpop.f32.mrb[22].mxu0  ;;  %v653_v9 = vadd.f32 %v990_v7, %v568_v51 }
 0x144   :  { %v992_v10 = vpop.f32.mrb[23].mxu0 }
 0x145   :  { %v993_v12 = vadd.f32 %v992_v10, %v991_v8  ;;  %v738_v13 = vadd.f32 %v737_v1, %v653_v9 }
 0x147   :  { %v658_v14 = vadd.f32 %v993_v12, %v573_v43  ;;  %748 = vst [vmem:[%s1948_s3 + $0x10] sm:$0xff] %v738_v13 }
 0x149   :  { %v743_v15 = vadd.f32 %v1051_v0, %v658_v14 }
 0x14b   :  { %749 = vst [vmem:[%s1948_s3 + $0x18] sm:$0xff] %v743_v15 }

</bundles_post_ra>
